<compile_context>
chip_gen: v7x
topology: tpu7x:2x2x1
jax: 0.10.0
libtpu: 0.0.40
codegen_flags: <defaults>
</compile_context>

<pallas_src>
import functools

import jax
import jax.numpy as jnp
from jax.experimental import pallas as pl
from jax.experimental.pallas import tpu as pltpu

COMBO_WEIGHT = (0.5, 0.5)
# gamma=2 is specialized to an explicit square (om * om) below (NaN-safe vs pow).
GAMMA = 2


def _combo_loss_kernel(x_ref, t_ref, out_ref, *, n_true, tile_n):
    # x_ref: [TILE_N, C] logits, t_ref: [TILE_N, 1] i32,
    # out_ref: [1, 1, 1] f32 per-tile partial sum.
    i = pl.program_id(0)

    x = x_ref[...].astype(jnp.float32)      # compute in f32 regardless of HBM dtype
    t = t_ref[...]                          # [TILE_N, 1] int32
    tn, c = x.shape

    # Numerically stable logsumexp along the class (lane) axis.
    m = jnp.max(x, axis=1, keepdims=True)                        # [TILE_N, 1]
    z = x - m                                                    # [TILE_N, C]
    lse = jnp.log(jnp.sum(jnp.exp(z), axis=1, keepdims=True))    # [TILE_N, 1]

    # z at the target column via where-select (no full logp materialization,
    # no one-hot matmul). Targets assumed valid in [0, C); an out-of-range
    # target silently contributes z_t = 0.
    # TODO(synk): for small C on v7x, both lane reductions (sum-exp and the
    # target select-sum) could be offloaded to the otherwise-idle MXU as
    # (TILE_N, C) @ ones(C, 1) matmuls to free the XLU slot.
    col = jax.lax.broadcasted_iota(jnp.int32, (tn, c), 1)
    z_t = jnp.sum(jnp.where(col == t, z, 0.0), axis=1, keepdims=True)  # [TILE_N, 1]
    lp_t = z_t - lse                                                   # log p_target

    om = 1.0 - jnp.exp(lp_t)
    per_sample = -lp_t * (COMBO_WEIGHT[0] * om * om + COMBO_WEIGHT[1])  # [TILE_N, 1]

    # Mask ragged / unspecified rows of the last (partial) block.  Select, not
    # multiply-by-mask, so garbage NaN/Inf in the unread tail never propagates.
    row = i * tile_n + jax.lax.broadcasted_iota(jnp.int32, (tn, 1), 0)
    valid = row < n_true
    out_ref[...] = jnp.sum(jnp.where(valid, per_sample, 0.0)).reshape(1, 1, 1)


def _choose_tile_n(n, c, max_rows=None):
    # Size the f32 working-set block to ~4 MiB.  Double-buffered input plus a
    # few f32 [TILE_N, C] temporaries (z, exp(z), the iota/compare) stays well
    # inside the 48 MiB VMEM limit below, and inside v7x's 64 MiB physical VMEM.
    budget = 4 * 1024 * 1024
    rows = budget // max(1, c * 4)
    rows = min(rows, 16384)
    if max_rows is not None:
        rows = min(rows, max_rows)
    rows = max(8, (rows // 8) * 8)
    if n <= rows:
        # Single block: block dim == full array dim (legal for any N, no tail).
        return n
    return rows


def combo_loss(x, target, *, max_tile_n=None):
    """x: [N, C] float logits (f32 or bf16), target: [N] int labels -> scalar f32."""
    n, c = x.shape
    t2d = target.astype(jnp.int32).reshape(n, 1)

    tile_n = _choose_tile_n(n, c, max_tile_n)
    grid_n = pl.cdiv(n, tile_n)

    kernel = functools.partial(_combo_loss_kernel, n_true=n, tile_n=tile_n)

    partials = pl.pallas_call(
        kernel,
        out_shape=jax.ShapeDtypeStruct((grid_n, 1, 1), jnp.float32),
        grid=(grid_n,),
        in_specs=[
            pl.BlockSpec((tile_n, c), lambda i: (i, 0)),
            pl.BlockSpec((tile_n, 1), lambda i: (i, 0)),
        ],
        # Per-tile partial sums; last two block dims equal the full array dims,
        # so the layout is legal for any grid size.
        out_specs=pl.BlockSpec((1, 1, 1), lambda i: (i, 0, 0)),
        compiler_params=pltpu.CompilerParams(
            # Each grid step writes its own output block -> fully parallel;
            # lets v7x's two TensorCores split the batch, neutral on v5e/v6e.
            dimension_semantics=("parallel",),
            vmem_limit_bytes=48 * 1024 * 1024,
        ),
    )(x, t2d)
    # Tiny final reduction + mean in JAX (also better accumulation precision
    # than a single serial scalar accumulator).
    return jnp.sum(partials) / n


def _reference_combo_loss(x, target):
    # Pure-JAX reference mirroring the PyTorch module.
    logp = jax.nn.log_softmax(x.astype(jnp.float32), axis=1)
    lp_t = jnp.take_along_axis(logp, target[:, None].astype(jnp.int32), axis=1)[:, 0]
    pt = jnp.exp(lp_t)
    focal = jnp.mean(-((1.0 - pt) ** 2) * lp_t)
    ce = jnp.mean(-lp_t)
    return COMBO_WEIGHT[0] * focal + COMBO_WEIGHT[1] * ce


if __name__ == "__main__":
    key = jax.random.PRNGKey(0)
    k1, k2, k3, k4 = jax.random.split(key, 4)

    # Case 1: aligned batch (N multiple of 8), single block.
    N1, C1 = 8, 32
    x1 = jax.random.normal(k1, (N1, C1), dtype=jnp.float32)
    t1 = jax.random.randint(k2, (N1,), 0, C1, dtype=jnp.int32)
    loss1 = combo_loss(x1, t1)
    jax.block_until_ready(loss1)
    ref1 = _reference_combo_loss(x1, t1)
    assert jnp.allclose(loss1, ref1, atol=1e-5, rtol=1e-5), (loss1, ref1)

    # Case 2: ragged batch, single full-array block (no padding anywhere).
    N2, C2 = 13, 40
    x2 = jax.random.normal(k3, (N2, C2), dtype=jnp.float32)
    t2 = jax.random.randint(k4, (N2,), 0, C2, dtype=jnp.int32)
    loss2 = combo_loss(x2, t2)
    jax.block_until_ready(loss2)
    ref2 = _reference_combo_loss(x2, t2)
    assert jnp.allclose(loss2, ref2, atol=1e-5, rtol=1e-5), (loss2, ref2)

    # Case 3: force multiple tiles (max_tile_n=8) to exercise the partial tail
    # block + in-kernel row masking + per-tile partial-sum path.
    loss3 = combo_loss(x2, t2, max_tile_n=8)
    jax.block_until_ready(loss3)
    assert jnp.allclose(loss3, ref2, atol=1e-5, rtol=1e-5), (loss3, ref2)

    print("KERNEL_OK")
</pallas_src>

<mosaic_0001>
module attributes {stable_mosaic.version = 11 : i64} {
  func.func @_combo_loss_kernel(%arg0: i32, %arg1: memref<8x32xf32, #tpu.memory_space<vmem>>, %arg2: memref<8x1xi32, #tpu.memory_space<vmem>>, %arg3: memref<1x1x1xf32, #tpu.memory_space<vmem>>) attributes {dimension_semantics = [#tpu.dimension_semantics<parallel>], iteration_bounds = array<i64: 1>, scalar_prefetch = 0 : i64, scratch_operands = 0 : i64, tpu.core_type = #tpu.core_type<tc>, window_params = [{transform_indices = @transform_0, window_bounds = array<i64: 8, 32>}, {transform_indices = @transform_1, window_bounds = array<i64: 8, 1>}, {transform_indices = @transform_2, window_bounds = array<i64: 1, 1, 1>}]} {
    %c0 = arith.constant 0 : index
    %c0_0 = arith.constant 0 : index
    %0 = vector.load %arg1[%c0, %c0_0] : memref<8x32xf32, #tpu.memory_space<vmem>>, vector<8x32xf32>
    %c0_1 = arith.constant 0 : index
    %c0_2 = arith.constant 0 : index
    %1 = vector.load %arg2[%c0_1, %c0_2] : memref<8x1xi32, #tpu.memory_space<vmem>>, vector<8x1xi32>
    %cst = arith.constant dense<0xFF800000> : vector<8xf32>
    %2 = vector.multi_reduction <maximumf>, %0, %cst [1] : vector<8x32xf32> to vector<8xf32>
    %3 = vector.shape_cast %2 : vector<8xf32> to vector<8x1xf32>
    %4 = vector.broadcast %3 : vector<8x1xf32> to vector<8x32xf32>
    %5 = arith.subf %0, %4 : vector<8x32xf32>
    %6 = math.exp %5 : vector<8x32xf32>
    %cst_3 = arith.constant dense<0.000000e+00> : vector<8xf32>
    %7 = vector.multi_reduction <add>, %6, %cst_3 [1] : vector<8x32xf32> to vector<8xf32>
    %8 = vector.shape_cast %7 : vector<8xf32> to vector<8x1xf32>
    %9 = math.log %8 : vector<8x1xf32>
    %10 = tpu.iota {dimensions = array<i32: 1>} : vector<8x32xi32>
    %11 = vector.broadcast %1 : vector<8x1xi32> to vector<8x32xi32>
    %12 = arith.cmpi eq, %10, %11 : vector<8x32xi32>
    %cst_4 = arith.constant 0.000000e+00 : f32
    %13 = vector.broadcast %cst_4 : f32 to vector<8x32xf32>
    %14 = arith.select %12, %5, %13 : vector<8x32xi1>, vector<8x32xf32>
    %cst_5 = arith.constant dense<0.000000e+00> : vector<8xf32>
    %15 = vector.multi_reduction <add>, %14, %cst_5 [1] : vector<8x32xf32> to vector<8xf32>
    %16 = vector.shape_cast %15 : vector<8xf32> to vector<8x1xf32>
    %17 = arith.subf %16, %9 : vector<8x1xf32>
    %18 = math.exp %17 : vector<8x1xf32>
    %cst_6 = arith.constant 1.000000e+00 : f32
    %19 = vector.broadcast %cst_6 : f32 to vector<8x1xf32>
    %20 = arith.subf %19, %18 : vector<8x1xf32>
    %cst_7 = arith.constant 0.000000e+00 : f32
    %21 = vector.broadcast %cst_7 : f32 to vector<8x1xf32>
    %22 = arith.subf %21, %17 : vector<8x1xf32>
    %cst_8 = arith.constant 5.000000e-01 : f32
    %23 = vector.broadcast %cst_8 : f32 to vector<8x1xf32>
    %24 = arith.mulf %23, %20 : vector<8x1xf32>
    %25 = arith.mulf %24, %20 : vector<8x1xf32>
    %cst_9 = arith.constant 5.000000e-01 : f32
    %26 = vector.broadcast %cst_9 : f32 to vector<8x1xf32>
    %27 = arith.addf %25, %26 : vector<8x1xf32>
    %28 = arith.mulf %22, %27 : vector<8x1xf32>
    %c8_i32 = arith.constant 8 : i32
    %29 = arith.muli %arg0, %c8_i32 : i32
    %30 = tpu.iota {dimensions = array<i32: 0>} : vector<8x1xi32>
    %31 = vector.broadcast %29 : i32 to vector<8x1xi32>
    %32 = arith.addi %31, %30 : vector<8x1xi32>
    %c8_i32_10 = arith.constant 8 : i32
    %33 = vector.broadcast %c8_i32_10 : i32 to vector<8x1xi32>
    %34 = arith.cmpi slt, %32, %33 : vector<8x1xi32>
    %cst_11 = arith.constant 0.000000e+00 : f32
    %35 = vector.broadcast %cst_11 : f32 to vector<8x1xf32>
    %36 = arith.select %34, %28, %35 : vector<8x1xi1>, vector<8x1xf32>
    %37 = vector.shape_cast %36 : vector<8x1xf32> to vector<1x8x1xf32>
    %cst_12 = arith.constant dense<0.000000e+00> : vector<1xf32>
    %38 = vector.multi_reduction <add>, %37, %cst_12 [1, 2] : vector<1x8x1xf32> to vector<1xf32>
    %39 = vector.shape_cast %38 : vector<1xf32> to vector<1x1x1xf32>
    %40 = vector.extract %39[0, 0, 0] : f32 from vector<1x1x1xf32>
    %41 = vector.broadcast %40 : f32 to vector<1x1x1xf32>
    %c0_13 = arith.constant 0 : index
    %c0_14 = arith.constant 0 : index
    %c0_15 = arith.constant 0 : index
    %42 = vector.load %arg3[%c0_13, %c0_14, %c0_15] : memref<1x1x1xf32, #tpu.memory_space<vmem>>, vector<1x1x1xf32>
    tpu.vector_store %arg3[%c0_13, %c0_14, %c0_15], %41 {strides = array<i32>} : memref<1x1x1xf32, #tpu.memory_space<vmem>>, vector<1x1x1xf32>,
    return
  }
  func.func @transform_0(%arg0: i32) -> (i32, i32) {
    %c0_i32 = arith.constant 0 : i32
    %c0_i32_0 = arith.constant 0 : i32
    return %arg0, %c0_i32 : i32, i32
  }
  func.func @transform_1(%arg0: i32) -> (i32, i32) {
    %c0_i32 = arith.constant 0 : i32
    %c0_i32_0 = arith.constant 0 : i32
    return %arg0, %c0_i32 : i32, i32
  }
  func.func @transform_2(%arg0: i32) -> (i32, i32, i32) {
    %c0_i32 = arith.constant 0 : i32
    %c0_i32_0 = arith.constant 0 : i32
    %c0_i32_1 = arith.constant 0 : i32
    return %arg0, %c0_i32, %c0_i32_0 : i32, i32, i32
  }
}

</mosaic_0001>

<bundles_post_ra>
// kernel: tpu_custom_call.1
= control target key start
LH: loop header
LB: loop body
LE: loop exit
PB: predicated region body
PF: predicated region fallthrough
CT: control target
= control target key end

     0   :  { %vm14_vm0 = vcmask 261120   ;;  %s153_s0 = inlined_call_operand.vmem [shape: f32[8,32], index: 0, kind: input, shape index: {}]   ;;  %s154_s1 = inlined_call_operand.vmem [shape: s32[8,1], index: 1, kind: input, shape index: {}]   ;;  %s155_s2 = inlined_call_operand.hbm [shape: f32[1,1,1], index: 2, kind: output, shape index: {}]  }
   0x1   :  { %v12_v0 = vld [vmem:[%s153_s0] sm:$0xff] }
   0x2   :  { %7 = vsyncpa [#allocation3], 0  ;;  %v15_v1 = vsel %vm14_vm0, %v12_v0, -inf  ;;  %v115_v2 = vmov 0   ;;  %v13_v3 = vld [vmem:[%s154_s1] sm:$0xff]  ;;  %v26_v7 = vlaneseq  ;;  %vm52_vm2 = vcmask 7168  }
   0x3   :  { %84 = vset.pattern.permute.xlu0 %v115_v2  ;;  %s116_s0 = smov [#allocation2]   ;;  %vm64_vm3 = vcmask 0  }
   0x4   :  { %16 = vmax.xlane.f32.xlu0 %v15_v1  ;;  %v27_v8 = vand.u32 127, %v26_v7  ;;  %s72_s1 = sshll.u32 %s116_s0, 4  ;;  %s73_s1 = int_to_ptr.vmem [resolvable:$true] %s72_s1 }
   0x5   :  { %s91_s14 = scalar_lea.vmem %s73_s1, 16  ;;  %s95_s15 = scalar_lea.vmem %s73_s1, 32 }
   0x6   :  { %p92_p0 = scmp.ne.s32.totalorder %s73_s1, %s91_s14  ;;  %p96_p1 = scmp.lt.s32.totalorder %s73_s1, %s73_s1 }
   0x7   :  { %p97_p2 = scmp.lt.s32.totalorder %s95_s15, %s91_s14 }
   0x9   :  { %p98_p3 = por %p97_p2, %p96_p1 }
   0xb   :  { %p99_p4 = pnand %p98_p3, %p92_p0 }
  0x1a   :  { %29 = vperm.xlu0 %84, %v13_v3  }
  0x91   :  { %v17_v4 = vpop.xlane.xlu0 %16 }
  0x92   :  { %v18_v5 = vsub.f32 %v12_v0, %v17_v4 }
  0x94   :  { %v19_v6 = vmul.f32 1.442695, %v18_v5 }
  0x96   :  { %85 = vpow2.f32 %v19_v6 }
  0x99   :  { %v30_v9 = vpop.permute.xlu0 %29 }
  0x9a   :  { %vm31_vm1 = vcmp.eq.s32.totalorder %v27_v8, %v30_v9 }
  0x9b   :  { %v32_v12 = vsel %vm31_vm1, %v18_v5, 0.0 }
  0x9c   :  { %v33_v13 = vsel %vm14_vm0, %v32_v12, 0.0 }
  0xa0   :  { %v86_v10 = vpop.eup %85 }
  0xa1   :  { %v21_v11 = vsel %vm14_vm0, %v86_v10, 0.0 }
  0xa2   :  { %22 = vadd.xlane.f32.xlu1 %v21_v11 }
  0xa6   :  { %34 = vadd.xlane.f32.xlu1 %v33_v13 }
 0x12f   :  { %v23_v14 = vpop.xlane.xlu1 %22 }
 0x130   :  { %87 = vlog2.f32 %v23_v14 }
 0x133   :  { %v35_v17 = vpop.xlane.xlu1 %34 }
 0x13a   :  { %v88_v15 = vpop.eup %87 }
 0x13b   :  { %v25_v16 = vmul.f32 0.6931472, %v88_v15 }
 0x13d   :  { %v36_v18 = vsub.f32 %v35_v17, %v25_v16 }
 0x13f   :  { %v37_v19 = vmul.f32 1.442695, %v36_v18  ;;  %v40_v24 = vsub.f32 0.0, %v36_v18 }
 0x141   :  { %89 = vpow2.f32 %v37_v19 }
 0x14b   :  { %v90_v20 = vpop.eup %89 }
 0x14c   :  { %v39_v21 = vsub.f32 1.0, %v90_v20 }
 0x14e   :  { %v41_v22 = vmul.f32 0.5, %v39_v21 }
 0x150   :  { %v42_v23 = vmul.f32 %v41_v22, %v39_v21 }
 0x152   :  { %v43_v25 = vadd.f32 0.5, %v42_v23 }
 0x154   :  { %v44_v26 = vmul.f32 %v43_v25, %v40_v24 }
 0x156   :  { %v53_v27 = vsel %vm52_vm2, %v44_v26, 0.0 }
 0x157   :  { %54 = vadd.xlane.f32.xlu1 %v53_v27 }
 0x1e4   :  { %v55_v28 = vpop.xlane.xlu1 %54 }
 0x1e5   :  { %v56_v29 = vrot.slane %v55_v28, 4 }
 0x1e7   :  { %v57_v30 = vadd.f32 %v56_v29, %v55_v28 }
 0x1e9   :  { %v58_v31 = vrot.slane %v57_v30, 2 }
 0x1eb   :  { %v59_v32 = vadd.f32 %v58_v31, %v57_v30 }
 0x1ed   :  { %v60_v33 = vrot.slane %v59_v32, 1 }
 0x1ef   :  { %v61_v34 = vadd.f32 %v60_v33, %v59_v32 }
 0x1f1   :  { %80 = vpush %v61_v34 }
 0x222   :  { %s81_s13 = spop %80 }
 0x223   :  { %v63_v35 = vstv %s81_s13 }
 0x224   :  { %65 = vst.msk [vmem:[#allocation2] sm:$0x1] %vm64_vm3, %v63_v35 }
 0x225   :  { %102 = shalt.err (!%p99_p4)
}
 0x226   :  { %s103_s18 = scalar_lea.hbm %s155_s2, 16 }
 0x227   :  { %p104_p5 = scmp.ne.s32.totalorder %s155_s2, %s103_s18  ;;  %p107_p6 = scmp.lt.u32.totalorder %s103_s18, %s155_s2 }
 0x229   :  { %p109_p7 = pnand %p107_p6, %p104_p5 }
 0x22b   :  { %112 = shalt.err (!%p109_p7)
}
 0x22c   :  { %75 = dma.vmem_to_hbm [thread:$0]  %s73_s1, 16, %s155_s2, [#allocation3]  }
 0x22d   :  { %113 = dma.done.wait [#allocation3], 16  }
 0x22e   :  { %114 = vsyncadd [#allocation3], 4294967280 }
 0x22f   :  { %79 = vsyncpa [#allocation3], 1 }

</bundles_post_ra>
